<compile_context>
chip_gen: v7x
topology: tpu7x:2x2x1
jax: 0.10.0
libtpu: 0.0.40
codegen_flags: <defaults>
</compile_context>

<pallas_src>
import math

import jax
import jax.numpy as jnp
from jax.experimental import pallas as pl
from jax.experimental.pallas import tpu as pltpu

# ----------------------------- configuration --------------------------------
B = 2          # batch
SQ = 8         # attender sequence length
SK = 8         # attendee sequence length
H = 32         # hidden size
HEAD_NUM = 4   # number of heads (H % HEAD_NUM == 0)
HEAD_DIM = H // HEAD_NUM
SCALE = False  # matches the PyTorch default Attention(scale=False)

NQ = B * SQ    # attender rows
NK = B * SK    # attendee rows


def _gelu(x):
    # GPT-2 tanh-approximation gelu (the `gelu` referenced by MLPLayer).
    return 0.5 * x * (1.0 + jnp.tanh(
        math.sqrt(2.0 / math.pi) * (x + 0.044715 * x * x * x)))


# ------------------------------- kernel --------------------------------------
def attention_kernel(x_ref, wcat_ref, bcat_ref, mask_ref, wfused_ref, out_ref):
    f32 = jnp.float32

    # Single packed projection: [32,32] @ [32,128] + [1,128].
    #   cols [0:H)      -> Q       (valid for attender rows 0:NQ)
    #   cols [H:2H)     -> K       (valid for attendee rows NQ:NQ+NK)
    #   cols [2H:3H)    -> V       (valid for attendee rows NQ:NQ+NK)
    #   cols [3H:4H)    -> x @ Wmlp_x + b_fused  (valid for attender rows)
    proj = (jnp.dot(x_ref[...], wcat_ref[...], preferred_element_type=f32)
            + bcat_ref[...])                                    # [32, 128]

    q2 = proj[:NQ, 0:H]                                         # [NQ, H]
    # Multiplicative attendee mask folded into K once: q.(k*m) == (q.k)*m.
    k2 = proj[NQ:, H:2 * H] * mask_ref[...]                     # [NK, H]
    v2 = proj[NQ:, 2 * H:3 * H]                                  # [NK, H]
    acc = proj[:NQ, 3 * H:4 * H]                                 # [NQ, H]

    # Per-batch attention; all slices stay 2-D and sublane-aligned on rows.
    batch_outs = []
    for b in range(B):
        qb = q2[b * SQ:(b + 1) * SQ, :]                          # [SQ, H]
        kb = k2[b * SK:(b + 1) * SK, :]                          # [SK, H]
        vb = v2[b * SK:(b + 1) * SK, :]                          # [SK, H]
        kbT = kb.T                                               # [H, SK] (1 XLU transpose / batch)

        head_outs = []
        for h in range(HEAD_NUM):
            lo = h * HEAD_DIM
            qh = qb[:, lo:lo + HEAD_DIM]                         # [SQ, d]
            khT = kbT[lo:lo + HEAD_DIM, :]                       # [d, SK] (sublane-aligned slice)
            s = jnp.dot(qh, khT, preferred_element_type=f32)     # [SQ, SK]
            if SCALE:
                s = s * (1.0 / math.sqrt(HEAD_DIM))

            m = jnp.max(s, axis=-1, keepdims=True)
            e = jnp.exp(s - m)
            # Reciprocal on the EUP slot instead of a VPU divide.
            p = e * pl.reciprocal(jnp.sum(e, axis=-1, keepdims=True),
                                  approx=True)                   # softmax
            # attn_dropout is identity at inference.
            ah = jnp.dot(p, vb[:, lo:lo + HEAD_DIM],
                         preferred_element_type=f32)             # [SQ, d]
            head_outs.append(ah)

        batch_outs.append(jnp.concatenate(head_outs, axis=1))    # [SQ, H] (merge_heads)

    merged = jnp.concatenate(batch_outs, axis=0)                 # [NQ, H]

    # Fused c_proj @ Wmlp_bottom in one depth-32 matmul, plus gelu.
    acc = acc + jnp.dot(merged, wfused_ref[...], preferred_element_type=f32)
    out_ref[...] = _gelu(acc)


# ------------------------------- wrapper --------------------------------------
def attention_forward(attender, attendee, mask, params):
    wattn, battn, wproj, bproj, wmlp, bmlp = params

    # One-time wrapper-side parameter preprocessing (split + fuse + pack).
    wq, wk, wv = wattn[:, :H], wattn[:, H:2 * H], wattn[:, 2 * H:]
    bq, bk, bv = battn[:, :H], battn[:, H:2 * H], battn[:, 2 * H:]
    wmlpx = wmlp[:H, :]                           # attender half of the MLP
    wfused = wproj @ wmlp[H:, :]                  # [H, H]  c_proj fused into MLP
    bfused = bproj @ wmlp[H:, :] + bmlp           # [1, H]

    w_cat = jnp.concatenate([wq, wk, wv, wmlpx], axis=1)     # [H, 4H] = [32, 128]
    b_cat = jnp.concatenate([bq, bk, bv, bfused], axis=1)    # [1, 4H] = [1, 128]

    # Batch-flatten done here (free in XLA) so the kernel sees 2-D tiles.
    x_all = jnp.concatenate(
        [attender.reshape(NQ, H), attendee.reshape(NK, H)], axis=0)  # [32, 32]
    mask2 = mask.astype(jnp.float32).reshape(NK, 1)                  # [16, 1]

    vmem_spec = pl.BlockSpec(memory_space=pltpu.MemorySpace.VMEM)
    out2d = pl.pallas_call(
        attention_kernel,
        out_shape=jax.ShapeDtypeStruct((NQ, H), jnp.float32),
        in_specs=[vmem_spec] * 5,
        out_specs=vmem_spec,
    )(x_all, w_cat, b_cat, mask2, wfused)
    return out2d.reshape(B, SQ, H)


# ------------------------ pure-JAX reference (sanity) -------------------------
def attention_reference(attender, attendee, mask, params):
    wattn, battn, wproj, bproj, wmlp, bmlp = params
    ext_q = attender @ wattn + battn[0]
    ext_kv = attendee @ wattn + battn[0]
    q = ext_q[..., :H]
    k = ext_kv[..., H:2 * H]
    v = ext_kv[..., 2 * H:]

    def split(x):  # [B,S,H] -> [B,head,S,d]
        return x.reshape(x.shape[0], x.shape[1], HEAD_NUM, HEAD_DIM).transpose(0, 2, 1, 3)

    qh, kh, vh = split(q), split(k), split(v)
    s = jnp.einsum("bhqd,bhkd->bhqk", qh, kh)
    if SCALE:
        s = s / math.sqrt(HEAD_DIM)
    s = s * mask[:, None, None, :]
    p = jax.nn.softmax(s, axis=-1)
    a = jnp.einsum("bhqk,bhkd->bhqd", p, vh)
    a = a.transpose(0, 2, 1, 3).reshape(attender.shape[0], SQ, H)
    a = a @ wproj + bproj[0]
    cat = jnp.concatenate([attender, a], axis=-1)
    return _gelu(cat @ wmlp + bmlp[0])


# --------------------------------- main ---------------------------------------
if __name__ == "__main__":
    key = jax.random.PRNGKey(0)
    ks = jax.random.split(key, 9)

    attender = jax.random.normal(ks[0], (B, SQ, H), jnp.float32)
    attendee = jax.random.normal(ks[1], (B, SK, H), jnp.float32)
    # attendee_mask: [B, SK] of 0/1 (reference multiplies it into the scores)
    mask = (jax.random.uniform(ks[2], (B, SK)) > 0.25).astype(jnp.float32)

    # Conv1D weights are [in, out]; GPT-2-style init (std=0.02), biases small.
    wattn = 0.02 * jax.random.normal(ks[3], (H, 3 * H), jnp.float32)
    battn = 0.02 * jax.random.normal(ks[4], (1, 3 * H), jnp.float32)
    wproj = 0.02 * jax.random.normal(ks[5], (H, H), jnp.float32)
    bproj = 0.02 * jax.random.normal(ks[6], (1, H), jnp.float32)
    wmlp = 0.02 * jax.random.normal(ks[7], (2 * H, H), jnp.float32)
    bmlp = 0.02 * jax.random.normal(ks[8], (1, H), jnp.float32)
    params = (wattn, battn, wproj, bproj, wmlp, bmlp)

    out = attention_forward(attender, attendee, mask, params)
    out = jax.block_until_ready(out)

    ref = attention_reference(attender, attendee, mask, params)
    assert out.shape == (B, SQ, H)
    assert jnp.allclose(out, ref, rtol=1e-3, atol=1e-3), "mismatch vs reference"

    print("KERNEL_OK")
</pallas_src>

<mosaic_0001>
module attributes {stable_mosaic.version = 11 : i64} {
  func.func @attention_kernel(%arg0: memref<32x32xf32, #tpu.memory_space<vmem>>, %arg1: memref<32x128xf32, #tpu.memory_space<vmem>>, %arg2: memref<1x128xf32, #tpu.memory_space<vmem>>, %arg3: memref<16x1xf32, #tpu.memory_space<vmem>>, %arg4: memref<32x32xf32, #tpu.memory_space<vmem>>, %arg5: memref<16x32xf32, #tpu.memory_space<vmem>>) attributes {dimension_semantics = [], scalar_prefetch = 0 : i64, scratch_operands = 0 : i64, tpu.core_type = #tpu.core_type<tc>} {
    %c0 = arith.constant 0 : index
    %c0_0 = arith.constant 0 : index
    %0 = vector.load %arg0[%c0, %c0_0] : memref<32x32xf32, #tpu.memory_space<vmem>>, vector<32x32xf32>
    %c0_1 = arith.constant 0 : index
    %c0_2 = arith.constant 0 : index
    %1 = vector.load %arg1[%c0_1, %c0_2] : memref<32x128xf32, #tpu.memory_space<vmem>>, vector<32x128xf32>
    %cst = arith.constant dense<0.000000e+00> : vector<32x128xf32>
    %2 = tpu.matmul %0, %1, %cst {dimension_numbers = #tpu.dot_dimension_numbers<[1], [0], [0], [1], [0, 0, 1, 1], [], []>} : vector<32x32xf32>, vector<32x128xf32>, vector<32x128xf32> -> vector<32x128xf32>
    %c0_3 = arith.constant 0 : index
    %c0_4 = arith.constant 0 : index
    %3 = vector.load %arg2[%c0_3, %c0_4] : memref<1x128xf32, #tpu.memory_space<vmem>>, vector<1x128xf32>
    %4 = vector.broadcast %3 : vector<1x128xf32> to vector<32x128xf32>
    %5 = arith.addf %2, %4 : vector<32x128xf32>
    %6 = vector.extract_strided_slice %5 {offsets = [0, 0], sizes = [16, 32], strides = [1, 1]} : vector<32x128xf32> to vector<16x32xf32>
    %7 = vector.extract_strided_slice %5 {offsets = [16, 32], sizes = [16, 32], strides = [1, 1]} : vector<32x128xf32> to vector<16x32xf32>
    %c0_5 = arith.constant 0 : index
    %c0_6 = arith.constant 0 : index
    %8 = vector.load %arg3[%c0_5, %c0_6] : memref<16x1xf32, #tpu.memory_space<vmem>>, vector<16x1xf32>
    %9 = vector.broadcast %8 : vector<16x1xf32> to vector<16x32xf32>
    %10 = arith.mulf %7, %9 : vector<16x32xf32>
    %11 = vector.extract_strided_slice %5 {offsets = [16, 64], sizes = [16, 32], strides = [1, 1]} : vector<32x128xf32> to vector<16x32xf32>
    %12 = vector.extract_strided_slice %5 {offsets = [0, 96], sizes = [16, 32], strides = [1, 1]} : vector<32x128xf32> to vector<16x32xf32>
    %13 = vector.extract_strided_slice %6 {offsets = [0, 0], sizes = [8, 32], strides = [1, 1]} : vector<16x32xf32> to vector<8x32xf32>
    %14 = vector.extract_strided_slice %10 {offsets = [0, 0], sizes = [8, 32], strides = [1, 1]} : vector<16x32xf32> to vector<8x32xf32>
    %15 = vector.extract_strided_slice %11 {offsets = [0, 0], sizes = [8, 32], strides = [1, 1]} : vector<16x32xf32> to vector<8x32xf32>
    %16 = tpu.transpose %14, [1, 0] : vector<8x32xf32> -> vector<32x8xf32>
    %17 = vector.extract_strided_slice %13 {offsets = [0, 0], sizes = [8, 8], strides = [1, 1]} : vector<8x32xf32> to vector<8x8xf32>
    %18 = vector.extract_strided_slice %16 {offsets = [0, 0], sizes = [8, 8], strides = [1, 1]} : vector<32x8xf32> to vector<8x8xf32>
    %cst_7 = arith.constant dense<0.000000e+00> : vector<8x8xf32>
    %19 = tpu.matmul %17, %18, %cst_7 {dimension_numbers = #tpu.dot_dimension_numbers<[1], [0], [0], [1], [0, 0, 1, 1], [], []>} : vector<8x8xf32>, vector<8x8xf32>, vector<8x8xf32> -> vector<8x8xf32>
    %cst_8 = arith.constant dense<0xFF800000> : vector<8xf32>
    %20 = vector.multi_reduction <maximumf>, %19, %cst_8 [1] : vector<8x8xf32> to vector<8xf32>
    %21 = vector.shape_cast %20 : vector<8xf32> to vector<8x1xf32>
    %22 = vector.broadcast %21 : vector<8x1xf32> to vector<8x8xf32>
    %23 = arith.subf %19, %22 : vector<8x8xf32>
    %24 = math.exp %23 : vector<8x8xf32>
    %cst_9 = arith.constant dense<0.000000e+00> : vector<8xf32>
    %25 = vector.multi_reduction <add>, %24, %cst_9 [1] : vector<8x8xf32> to vector<8xf32>
    %26 = vector.shape_cast %25 : vector<8xf32> to vector<8x1xf32>
    %27 = tpu.reciprocal %26 {approx = true} : vector<8x1xf32> -> vector<8x1xf32>
    %28 = vector.broadcast %27 : vector<8x1xf32> to vector<8x8xf32>
    %29 = arith.mulf %24, %28 : vector<8x8xf32>
    %30 = vector.extract_strided_slice %15 {offsets = [0, 0], sizes = [8, 8], strides = [1, 1]} : vector<8x32xf32> to vector<8x8xf32>
    %cst_10 = arith.constant dense<0.000000e+00> : vector<8x8xf32>
    %31 = tpu.matmul %29, %30, %cst_10 {dimension_numbers = #tpu.dot_dimension_numbers<[1], [0], [0], [1], [0, 0, 1, 1], [], []>} : vector<8x8xf32>, vector<8x8xf32>, vector<8x8xf32> -> vector<8x8xf32>
    %32 = vector.extract_strided_slice %13 {offsets = [0, 8], sizes = [8, 8], strides = [1, 1]} : vector<8x32xf32> to vector<8x8xf32>
    %33 = vector.extract_strided_slice %16 {offsets = [8, 0], sizes = [8, 8], strides = [1, 1]} : vector<32x8xf32> to vector<8x8xf32>
    %cst_11 = arith.constant dense<0.000000e+00> : vector<8x8xf32>
    %34 = tpu.matmul %32, %33, %cst_11 {dimension_numbers = #tpu.dot_dimension_numbers<[1], [0], [0], [1], [0, 0, 1, 1], [], []>} : vector<8x8xf32>, vector<8x8xf32>, vector<8x8xf32> -> vector<8x8xf32>
    %cst_12 = arith.constant dense<0xFF800000> : vector<8xf32>
    %35 = vector.multi_reduction <maximumf>, %34, %cst_12 [1] : vector<8x8xf32> to vector<8xf32>
    %36 = vector.shape_cast %35 : vector<8xf32> to vector<8x1xf32>
    %37 = vector.broadcast %36 : vector<8x1xf32> to vector<8x8xf32>
    %38 = arith.subf %34, %37 : vector<8x8xf32>
    %39 = math.exp %38 : vector<8x8xf32>
    %cst_13 = arith.constant dense<0.000000e+00> : vector<8xf32>
    %40 = vector.multi_reduction <add>, %39, %cst_13 [1] : vector<8x8xf32> to vector<8xf32>
    %41 = vector.shape_cast %40 : vector<8xf32> to vector<8x1xf32>
    %42 = tpu.reciprocal %41 {approx = true} : vector<8x1xf32> -> vector<8x1xf32>
    %43 = vector.broadcast %42 : vector<8x1xf32> to vector<8x8xf32>
    %44 = arith.mulf %39, %43 : vector<8x8xf32>
    %45 = vector.extract_strided_slice %15 {offsets = [0, 8], sizes = [8, 8], strides = [1, 1]} : vector<8x32xf32> to vector<8x8xf32>
    %cst_14 = arith.constant dense<0.000000e+00> : vector<8x8xf32>
    %46 = tpu.matmul %44, %45, %cst_14 {dimension_numbers = #tpu.dot_dimension_numbers<[1], [0], [0], [1], [0, 0, 1, 1], [], []>} : vector<8x8xf32>, vector<8x8xf32>, vector<8x8xf32> -> vector<8x8xf32>
    %47 = vector.extract_strided_slice %13 {offsets = [0, 16], sizes = [8, 8], strides = [1, 1]} : vector<8x32xf32> to vector<8x8xf32>
    %48 = vector.extract_strided_slice %16 {offsets = [16, 0], sizes = [8, 8], strides = [1, 1]} : vector<32x8xf32> to vector<8x8xf32>
    %cst_15 = arith.constant dense<0.000000e+00> : vector<8x8xf32>
    %49 = tpu.matmul %47, %48, %cst_15 {dimension_numbers = #tpu.dot_dimension_numbers<[1], [0], [0], [1], [0, 0, 1, 1], [], []>} : vector<8x8xf32>, vector<8x8xf32>, vector<8x8xf32> -> vector<8x8xf32>
    %cst_16 = arith.constant dense<0xFF800000> : vector<8xf32>
    %50 = vector.multi_reduction <maximumf>, %49, %cst_16 [1] : vector<8x8xf32> to vector<8xf32>
    %51 = vector.shape_cast %50 : vector<8xf32> to vector<8x1xf32>
    %52 = vector.broadcast %51 : vector<8x1xf32> to vector<8x8xf32>
    %53 = arith.subf %49, %52 : vector<8x8xf32>
    %54 = math.exp %53 : vector<8x8xf32>
    %cst_17 = arith.constant dense<0.000000e+00> : vector<8xf32>
    %55 = vector.multi_reduction <add>, %54, %cst_17 [1] : vector<8x8xf32> to vector<8xf32>
    %56 = vector.shape_cast %55 : vector<8xf32> to vector<8x1xf32>
    %57 = tpu.reciprocal %56 {approx = true} : vector<8x1xf32> -> vector<8x1xf32>
    %58 = vector.broadcast %57 : vector<8x1xf32> to vector<8x8xf32>
    %59 = arith.mulf %54, %58 : vector<8x8xf32>
    %60 = vector.extract_strided_slice %15 {offsets = [0, 16], sizes = [8, 8], strides = [1, 1]} : vector<8x32xf32> to vector<8x8xf32>
    %cst_18 = arith.constant dense<0.000000e+00> : vector<8x8xf32>
    %61 = tpu.matmul %59, %60, %cst_18 {dimension_numbers = #tpu.dot_dimension_numbers<[1], [0], [0], [1], [0, 0, 1, 1], [], []>} : vector<8x8xf32>, vector<8x8xf32>, vector<8x8xf32> -> vector<8x8xf32>
    %62 = vector.extract_strided_slice %13 {offsets = [0, 24], sizes = [8, 8], strides = [1, 1]} : vector<8x32xf32> to vector<8x8xf32>
    %63 = vector.extract_strided_slice %16 {offsets = [24, 0], sizes = [8, 8], strides = [1, 1]} : vector<32x8xf32> to vector<8x8xf32>
    %cst_19 = arith.constant dense<0.000000e+00> : vector<8x8xf32>
    %64 = tpu.matmul %62, %63, %cst_19 {dimension_numbers = #tpu.dot_dimension_numbers<[1], [0], [0], [1], [0, 0, 1, 1], [], []>} : vector<8x8xf32>, vector<8x8xf32>, vector<8x8xf32> -> vector<8x8xf32>
    %cst_20 = arith.constant dense<0xFF800000> : vector<8xf32>
    %65 = vector.multi_reduction <maximumf>, %64, %cst_20 [1] : vector<8x8xf32> to vector<8xf32>
    %66 = vector.shape_cast %65 : vector<8xf32> to vector<8x1xf32>
    %67 = vector.broadcast %66 : vector<8x1xf32> to vector<8x8xf32>
    %68 = arith.subf %64, %67 : vector<8x8xf32>
    %69 = math.exp %68 : vector<8x8xf32>
    %cst_21 = arith.constant dense<0.000000e+00> : vector<8xf32>
    %70 = vector.multi_reduction <add>, %69, %cst_21 [1] : vector<8x8xf32> to vector<8xf32>
    %71 = vector.shape_cast %70 : vector<8xf32> to vector<8x1xf32>
    %72 = tpu.reciprocal %71 {approx = true} : vector<8x1xf32> -> vector<8x1xf32>
    %73 = vector.broadcast %72 : vector<8x1xf32> to vector<8x8xf32>
    %74 = arith.mulf %69, %73 : vector<8x8xf32>
    %75 = vector.extract_strided_slice %15 {offsets = [0, 24], sizes = [8, 8], strides = [1, 1]} : vector<8x32xf32> to vector<8x8xf32>
    %cst_22 = arith.constant dense<0.000000e+00> : vector<8x8xf32>
    %76 = tpu.matmul %74, %75, %cst_22 {dimension_numbers = #tpu.dot_dimension_numbers<[1], [0], [0], [1], [0, 0, 1, 1], [], []>} : vector<8x8xf32>, vector<8x8xf32>, vector<8x8xf32> -> vector<8x8xf32>
    %77 = tpu.concatenate %31, %46, %61, %76 in 1 : vector<8x8xf32>, vector<8x8xf32>, vector<8x8xf32>, vector<8x8xf32> -> vector<8x32xf32>
    %78 = vector.extract_strided_slice %6 {offsets = [8, 0], sizes = [8, 32], strides = [1, 1]} : vector<16x32xf32> to vector<8x32xf32>
    %79 = vector.extract_strided_slice %10 {offsets = [8, 0], sizes = [8, 32], strides = [1, 1]} : vector<16x32xf32> to vector<8x32xf32>
    %80 = vector.extract_strided_slice %11 {offsets = [8, 0], sizes = [8, 32], strides = [1, 1]} : vector<16x32xf32> to vector<8x32xf32>
    %81 = tpu.transpose %79, [1, 0] : vector<8x32xf32> -> vector<32x8xf32>
    %82 = vector.extract_strided_slice %78 {offsets = [0, 0], sizes = [8, 8], strides = [1, 1]} : vector<8x32xf32> to vector<8x8xf32>
    %83 = vector.extract_strided_slice %81 {offsets = [0, 0], sizes = [8, 8], strides = [1, 1]} : vector<32x8xf32> to vector<8x8xf32>
    %cst_23 = arith.constant dense<0.000000e+00> : vector<8x8xf32>
    %84 = tpu.matmul %82, %83, %cst_23 {dimension_numbers = #tpu.dot_dimension_numbers<[1], [0], [0], [1], [0, 0, 1, 1], [], []>} : vector<8x8xf32>, vector<8x8xf32>, vector<8x8xf32> -> vector<8x8xf32>
    %cst_24 = arith.constant dense<0xFF800000> : vector<8xf32>
    %85 = vector.multi_reduction <maximumf>, %84, %cst_24 [1] : vector<8x8xf32> to vector<8xf32>
    %86 = vector.shape_cast %85 : vector<8xf32> to vector<8x1xf32>
    %87 = vector.broadcast %86 : vector<8x1xf32> to vector<8x8xf32>
    %88 = arith.subf %84, %87 : vector<8x8xf32>
    %89 = math.exp %88 : vector<8x8xf32>
    %cst_25 = arith.constant dense<0.000000e+00> : vector<8xf32>
    %90 = vector.multi_reduction <add>, %89, %cst_25 [1] : vector<8x8xf32> to vector<8xf32>
    %91 = vector.shape_cast %90 : vector<8xf32> to vector<8x1xf32>
    %92 = tpu.reciprocal %91 {approx = true} : vector<8x1xf32> -> vector<8x1xf32>
    %93 = vector.broadcast %92 : vector<8x1xf32> to vector<8x8xf32>
    %94 = arith.mulf %89, %93 : vector<8x8xf32>
    %95 = vector.extract_strided_slice %80 {offsets = [0, 0], sizes = [8, 8], strides = [1, 1]} : vector<8x32xf32> to vector<8x8xf32>
    %cst_26 = arith.constant dense<0.000000e+00> : vector<8x8xf32>
    %96 = tpu.matmul %94, %95, %cst_26 {dimension_numbers = #tpu.dot_dimension_numbers<[1], [0], [0], [1], [0, 0, 1, 1], [], []>} : vector<8x8xf32>, vector<8x8xf32>, vector<8x8xf32> -> vector<8x8xf32>
    %97 = vector.extract_strided_slice %78 {offsets = [0, 8], sizes = [8, 8], strides = [1, 1]} : vector<8x32xf32> to vector<8x8xf32>
    %98 = vector.extract_strided_slice %81 {offsets = [8, 0], sizes = [8, 8], strides = [1, 1]} : vector<32x8xf32> to vector<8x8xf32>
    %cst_27 = arith.constant dense<0.000000e+00> : vector<8x8xf32>
    %99 = tpu.matmul %97, %98, %cst_27 {dimension_numbers = #tpu.dot_dimension_numbers<[1], [0], [0], [1], [0, 0, 1, 1], [], []>} : vector<8x8xf32>, vector<8x8xf32>, vector<8x8xf32> -> vector<8x8xf32>
    %cst_28 = arith.constant dense<0xFF800000> : vector<8xf32>
    %100 = vector.multi_reduction <maximumf>, %99, %cst_28 [1] : vector<8x8xf32> to vector<8xf32>
    %101 = vector.shape_cast %100 : vector<8xf32> to vector<8x1xf32>
    %102 = vector.broadcast %101 : vector<8x1xf32> to vector<8x8xf32>
    %103 = arith.subf %99, %102 : vector<8x8xf32>
    %104 = math.exp %103 : vector<8x8xf32>
    %cst_29 = arith.constant dense<0.000000e+00> : vector<8xf32>
    %105 = vector.multi_reduction <add>, %104, %cst_29 [1] : vector<8x8xf32> to vector<8xf32>
    %106 = vector.shape_cast %105 : vector<8xf32> to vector<8x1xf32>
    %107 = tpu.reciprocal %106 {approx = true} : vector<8x1xf32> -> vector<8x1xf32>
    %108 = vector.broadcast %107 : vector<8x1xf32> to vector<8x8xf32>
    %109 = arith.mulf %104, %108 : vector<8x8xf32>
    %110 = vector.extract_strided_slice %80 {offsets = [0, 8], sizes = [8, 8], strides = [1, 1]} : vector<8x32xf32> to vector<8x8xf32>
    %cst_30 = arith.constant dense<0.000000e+00> : vector<8x8xf32>
    %111 = tpu.matmul %109, %110, %cst_30 {dimension_numbers = #tpu.dot_dimension_numbers<[1], [0], [0], [1], [0, 0, 1, 1], [], []>} : vector<8x8xf32>, vector<8x8xf32>, vector<8x8xf32> -> vector<8x8xf32>
    %112 = vector.extract_strided_slice %78 {offsets = [0, 16], sizes = [8, 8], strides = [1, 1]} : vector<8x32xf32> to vector<8x8xf32>
    %113 = vector.extract_strided_slice %81 {offsets = [16, 0], sizes = [8, 8], strides = [1, 1]} : vector<32x8xf32> to vector<8x8xf32>
    %cst_31 = arith.constant dense<0.000000e+00> : vector<8x8xf32>
    %114 = tpu.matmul %112, %113, %cst_31 {dimension_numbers = #tpu.dot_dimension_numbers<[1], [0], [0], [1], [0, 0, 1, 1], [], []>} : vector<8x8xf32>, vector<8x8xf32>, vector<8x8xf32> -> vector<8x8xf32>
    %cst_32 = arith.constant dense<0xFF800000> : vector<8xf32>
    %115 = vector.multi_reduction <maximumf>, %114, %cst_32 [1] : vector<8x8xf32> to vector<8xf32>
    %116 = vector.shape_cast %115 : vector<8xf32> to vector<8x1xf32>
    %117 = vector.broadcast %116 : vector<8x1xf32> to vector<8x8xf32>
    %118 = arith.subf %114, %117 : vector<8x8xf32>
    %119 = math.exp %118 : vector<8x8xf32>
    %cst_33 = arith.constant dense<0.000000e+00> : vector<8xf32>
    %120 = vector.multi_reduction <add>, %119, %cst_33 [1] : vector<8x8xf32> to vector<8xf32>
    %121 = vector.shape_cast %120 : vector<8xf32> to vector<8x1xf32>
    %122 = tpu.reciprocal %121 {approx = true} : vector<8x1xf32> -> vector<8x1xf32>
    %123 = vector.broadcast %122 : vector<8x1xf32> to vector<8x8xf32>
    %124 = arith.mulf %119, %123 : vector<8x8xf32>
    %125 = vector.extract_strided_slice %80 {offsets = [0, 16], sizes = [8, 8], strides = [1, 1]} : vector<8x32xf32> to vector<8x8xf32>
    %cst_34 = arith.constant dense<0.000000e+00> : vector<8x8xf32>
    %126 = tpu.matmul %124, %125, %cst_34 {dimension_numbers = #tpu.dot_dimension_numbers<[1], [0], [0], [1], [0, 0, 1, 1], [], []>} : vector<8x8xf32>, vector<8x8xf32>, vector<8x8xf32> -> vector<8x8xf32>
    %127 = vector.extract_strided_slice %78 {offsets = [0, 24], sizes = [8, 8], strides = [1, 1]} : vector<8x32xf32> to vector<8x8xf32>
    %128 = vector.extract_strided_slice %81 {offsets = [24, 0], sizes = [8, 8], strides = [1, 1]} : vector<32x8xf32> to vector<8x8xf32>
    %cst_35 = arith.constant dense<0.000000e+00> : vector<8x8xf32>
    %129 = tpu.matmul %127, %128, %cst_35 {dimension_numbers = #tpu.dot_dimension_numbers<[1], [0], [0], [1], [0, 0, 1, 1], [], []>} : vector<8x8xf32>, vector<8x8xf32>, vector<8x8xf32> -> vector<8x8xf32>
    %cst_36 = arith.constant dense<0xFF800000> : vector<8xf32>
    %130 = vector.multi_reduction <maximumf>, %129, %cst_36 [1] : vector<8x8xf32> to vector<8xf32>
    %131 = vector.shape_cast %130 : vector<8xf32> to vector<8x1xf32>
    %132 = vector.broadcast %131 : vector<8x1xf32> to vector<8x8xf32>
    %133 = arith.subf %129, %132 : vector<8x8xf32>
    %134 = math.exp %133 : vector<8x8xf32>
    %cst_37 = arith.constant dense<0.000000e+00> : vector<8xf32>
    %135 = vector.multi_reduction <add>, %134, %cst_37 [1] : vector<8x8xf32> to vector<8xf32>
    %136 = vector.shape_cast %135 : vector<8xf32> to vector<8x1xf32>
    %137 = tpu.reciprocal %136 {approx = true} : vector<8x1xf32> -> vector<8x1xf32>
    %138 = vector.broadcast %137 : vector<8x1xf32> to vector<8x8xf32>
    %139 = arith.mulf %134, %138 : vector<8x8xf32>
    %140 = vector.extract_strided_slice %80 {offsets = [0, 24], sizes = [8, 8], strides = [1, 1]} : vector<8x32xf32> to vector<8x8xf32>
    %cst_38 = arith.constant dense<0.000000e+00> : vector<8x8xf32>
    %141 = tpu.matmul %139, %140, %cst_38 {dimension_numbers = #tpu.dot_dimension_numbers<[1], [0], [0], [1], [0, 0, 1, 1], [], []>} : vector<8x8xf32>, vector<8x8xf32>, vector<8x8xf32> -> vector<8x8xf32>
    %142 = tpu.concatenate %96, %111, %126, %141 in 1 : vector<8x8xf32>, vector<8x8xf32>, vector<8x8xf32>, vector<8x8xf32> -> vector<8x32xf32>
    %143 = tpu.concatenate %77, %142 in 0 : vector<8x32xf32>, vector<8x32xf32> -> vector<16x32xf32>
    %c0_39 = arith.constant 0 : index
    %c0_40 = arith.constant 0 : index
    %144 = vector.load %arg4[%c0_39, %c0_40] : memref<32x32xf32, #tpu.memory_space<vmem>>, vector<32x32xf32>
    %cst_41 = arith.constant dense<0.000000e+00> : vector<16x32xf32>
    %145 = tpu.matmul %143, %144, %cst_41 {dimension_numbers = #tpu.dot_dimension_numbers<[1], [0], [0], [1], [0, 0, 1, 1], [], []>} : vector<16x32xf32>, vector<32x32xf32>, vector<16x32xf32> -> vector<16x32xf32>
    %146 = arith.addf %12, %145 : vector<16x32xf32>
    %cst_42 = arith.constant 5.000000e-01 : f32
    %147 = vector.broadcast %cst_42 : f32 to vector<16x32xf32>
    %148 = arith.mulf %147, %146 : vector<16x32xf32>
    %cst_43 = arith.constant 4.471500e-02 : f32
    %149 = vector.broadcast %cst_43 : f32 to vector<16x32xf32>
    %150 = arith.mulf %149, %146 : vector<16x32xf32>
    %151 = arith.mulf %150, %146 : vector<16x32xf32>
    %152 = arith.mulf %151, %146 : vector<16x32xf32>
    %153 = arith.addf %146, %152 : vector<16x32xf32>
    %cst_44 = arith.constant 0.797884583 : f32
    %154 = vector.broadcast %cst_44 : f32 to vector<16x32xf32>
    %155 = arith.mulf %154, %153 : vector<16x32xf32>
    %156 = math.tanh %155 : vector<16x32xf32>
    %cst_45 = arith.constant 1.000000e+00 : f32
    %157 = vector.broadcast %cst_45 : f32 to vector<16x32xf32>
    %158 = arith.addf %157, %156 : vector<16x32xf32>
    %159 = arith.mulf %148, %158 : vector<16x32xf32>
    %c0_46 = arith.constant 0 : index
    %c0_47 = arith.constant 0 : index
    %160 = vector.load %arg5[%c0_46, %c0_47] : memref<16x32xf32, #tpu.memory_space<vmem>>, vector<16x32xf32>
    tpu.vector_store %arg5[%c0_46, %c0_47], %159 {strides = array<i32>} : memref<16x32xf32, #tpu.memory_space<vmem>>, vector<16x32xf32>,
    return
  }
}

</mosaic_0001>

<bundles_post_ra>
// kernel: tpu_custom_call.1
= control target key start
LH: loop header
LB: loop body
LE: loop exit
PB: predicated region body
PF: predicated region fallthrough
CT: control target
= control target key end

     0   :  { %10 = vsyncpa [#allocation3], 0  ;;  %s2316_s0 = inlined_call_operand.hbm [shape: f32[32,32], index: 0, kind: input, shape index: {}]   ;;  %s2317_s1 = inlined_call_operand.hbm [shape: f32[32,128], index: 1, kind: input, shape index: {}]   ;;  %s2318_s2 = inlined_call_operand.hbm [shape: f32[1,128], index: 2, kind: input, shape index: {}]   ;;  %s2319_s3 = inlined_call_operand.vmem [shape: f32[16,1], index: 3, kind: input, shape index: {}]   ;;  %s2320_s4 = inlined_call_operand.vmem [shape: f32[32,32], index: 4, kind: input, shape index: {}]   ;;  %s2321_s5 = inlined_call_operand.hbm [shape: f32[16,32], index: 5, kind: output, shape index: {}]  }
   0x1   :  { %11 = vsyncpa [#allocation6], 0 }
   0x2   :  { %12 = vsyncpa [#allocation4], 0  ;;  %s2036_s18 = smov [#allocation5]   ;;  %s2037_s20 = smov [#allocation2]  }
   0x3   :  { %s30_s19 = sshll.u32 %s2036_s18, 4  ;;  %s18_s21 = sshll.u32 %s2037_s20, 4  ;;  %s31_s19 = int_to_ptr.vmem [resolvable:$true] %s30_s19  ;;  %s2089_s21 = int_to_ptr.vmem [resolvable:$true] %s18_s21 }
   0x4   :  { %s1942_s24 = scalar_lea.hbm %s2317_s1, 512 }
   0x5   :  { %p1943_p0 = scmp.ne.s32.totalorder %s2317_s1, %s1942_s24  ;;  %p1946_p1 = scmp.lt.u32.totalorder %s1942_s24, %s2317_s1 }
   0x7   :  { %p1948_p2 = pnand %p1946_p1, %p1943_p0 }
   0x9   :  { %1951 = shalt.err (!%p1948_p2)
}
   0xa   :  { %s1952_s29 = scalar_lea.vmem %s31_s19, 512  ;;  %p1957_p4 = scmp.lt.s32.totalorder %s31_s19, %s31_s19 }
   0xb   :  { %p1953_p3 = scmp.ne.s32.totalorder %s31_s19, %s1952_s29  ;;  %p1958_p5 = scmp.lt.s32.totalorder %s1952_s29, %s1952_s29 }
   0xd   :  { %p1959_p6 = por %p1958_p5, %p1957_p4 }
   0xf   :  { %p1960_p7 = pnand %p1959_p6, %p1953_p3 }
  0x11   :  { %1963 = shalt.err (!%p1960_p7)
}
  0x12   :  { %s2038_s30 = smov 128   ;;  %s2039_s6 = smov 8  }
  0x13   :  { %36 = dma.hbm_to_vmem [thread:$0]  %s2317_s1, 512, %s31_s19, [#allocation6], %s2038_s30, %s2038_s30, %s2039_s6  }
  0x14   :  { %s1964_s11 = scalar_lea.hbm %s2316_s0, 512 }
  0x15   :  { %p1965_p8 = scmp.ne.s32.totalorder %s2316_s0, %s1964_s11  ;;  %p1968_p9 = scmp.lt.u32.totalorder %s1964_s11, %s2316_s0 }
  0x17   :  { %p1970_p10 = pnand %p1968_p9, %p1965_p8 }
  0x19   :  { %1973 = shalt.err (!%p1970_p10)
}
  0x1a   :  { %s1974_s16 = scalar_lea.vmem %s2089_s21, 512  ;;  %p1979_p12 = scmp.lt.s32.totalorder %s2089_s21, %s2089_s21 }
  0x1b   :  { %p1975_p11 = scmp.ne.s32.totalorder %s2089_s21, %s1974_s16  ;;  %p1980_p13 = scmp.lt.s32.totalorder %s1974_s16, %s1974_s16 }
  0x1d   :  { %p1981_p0 = por %p1980_p13, %p1979_p12 }
  0x1f   :  { %p1982_p1 = pnand %p1981_p0, %p1975_p11 }
  0x21   :  { %1985 = shalt.err (!%p1982_p1)
}
  0x22   :  { %24 = dma.hbm_to_vmem [thread:$0]  %s2316_s0, 512, %s2089_s21, [#allocation3], %s2038_s30, %s2038_s30, %s2039_s6  }
  0x23   :  { %s2040_s18 = smov [#allocation7]   ;;  %s1986_s23 = scalar_lea.hbm %s2318_s2, 16 }
  0x24   :  { %s43_s19 = sshll.u32 %s2040_s18, 4  ;;  %p1987_p2 = scmp.ne.s32.totalorder %s2318_s2, %s1986_s23  ;;  %s44_s19 = int_to_ptr.vmem [resolvable:$true] %s43_s19 }
  0x25   :  { %p1990_p3 = scmp.lt.u32.totalorder %s1986_s23, %s2318_s2 }
  0x27   :  { %p1992_p4 = pnand %p1990_p3, %p1987_p2 }
  0x29   :  { %1995 = shalt.err (!%p1992_p4)
}
  0x2a   :  { %s1996_s28 = scalar_lea.vmem %s44_s19, 16  ;;  %s2000_s0 = scalar_lea.vmem %s44_s19, 32 }
  0x2b   :  { %p1997_p5 = scmp.ne.s32.totalorder %s44_s19, %s1996_s28  ;;  %p2001_p6 = scmp.lt.s32.totalorder %s44_s19, %s44_s19 }
  0x2c   :  { %p2002_p7 = scmp.lt.s32.totalorder %s2000_s0, %s1996_s28 }
  0x2e   :  { %p2003_p8 = por %p2002_p7, %p2001_p6 }
  0x30   :  { %p2004_p9 = pnand %p2003_p8, %p1997_p5 }
  0x32   :  { %2007 = shalt.err (!%p2004_p9)
}
  0x33   :  { %46 = dma.hbm_to_vmem [thread:$0]  %s2318_s2, 16, %s44_s19, [#allocation6]  }
  0x34   :  { %2030 = dma.done.wait [#allocation3], 512  }
  0x35   :  { %2031 = vsyncadd [#allocation3], 4294966784 }
  0x36   :  { %2032 = dma.done.wait [#allocation6], 528  }
  0x37   :  { %2033 = vsyncadd [#allocation6], 4294966768  ;;  %v2041_v0 = vmov 0   ;;  %vm75_vm0 = vcmask 261120   ;;  %v64_v1 = vld [vmem:[#allocation5] sm:$0xff]  ;;  %v65_v2 = vld [vmem:[#allocation5 + $0x8] sm:$0xff] }
  0x38   :  { %1904 = vset.pattern.permute.xlu0 %v2041_v0  ;;  %1905 = vset.pattern.permute.xlu1 %v2041_v0  ;;  %v66_v3 = vld [vmem:[#allocation5 + $0x10] sm:$0xff]  ;;  %v1865_v4 = vpack.c.bf16 %v65_v2, %v64_v1  ;;  %v67_v5 = vld [vmem:[#allocation5 + $0x18] sm:$0xff]  ;;  %v60_v6 = vld [vmem:[#allocation2] sm:$0xff]  ;;  %v2042_v12 = vmov 0.0   ;;  %vm2043_vm1 = vmmov 0   ;;  %s2044_s2 = smov 96  }
  0x39   :  { %v1869_v7 = vpack.c.bf16 %v67_v5, %v66_v3  ;;  %1768 = vmatprep.mubr.msk.f32.mxu0 %vm75_vm0, %v60_v6  ;;  %v173_v8 = vld [vmem:[%s2319_s3] sm:$0xff]  ;;  %v61_v9 = vld [vmem:[#allocation2 + $0x8] sm:$0xff]  ;;  %v62_v10 = vld [vmem:[#allocation2 + $0x10] sm:$0xff]  ;;  %1774 = vmatprep.subr.mxu1 %v2042_v12  ;;  %vm190_vm2 = vcmask 64512   ;;  %s2045_s11 = smov 64   ;;  %s2046_s12 = smov 88  }
  0x3a   :  { %1866 = vmatprep.subr.bf16.mxu0 %v1865_v4  ;;  %177 = vperm.xlu0 %1904, %v173_v8   ;;  %v63_v11 = vld [vmem:[#allocation2 + $0x18] sm:$0xff]  ;;  %v1683_v13 = vld [vmem:[#allocation7] ss:$0 sm:$0xff]  ;;  %v174_v28 = vld [vmem:[%s2319_s3 + $0x8] sm:$0xff]  ;;  %s2047_s13 = smov 120   ;;  %s2048_s14 = smov 80  }
  0x3b   :  { %1868 = vmatpush3.bf16.msra.mxu0 %v1865_v4  ;;  %1776 = vmatprep.mubr.msk.f32.mxu1 %vm2043_vm1, %v2042_v12  ;;  %s2049_s15 = smov 112   ;;  %s2050_s16 = smov 104   ;;  %vm862_vm3 = vcmask 130048   ;;  %vm864_vm4 = vcmask 195584  }
  0x3c   :  { %1870 = vmatprep.subr.bf16.mxu0 %v1869_v7  ;;  %s2051_s3 = smov 72   ;;  %s2052_s1 = smov 48  }
  0x3d   :  { %s2053_s17 = smov 40   ;;  %s2054_s18 = smov 56  }
  0x3e   :  { %s2055_s19 = smov 16   ;;  %s2056_s0 = smov 24  }
  0x3f   :  { %1872 = vmatpush3.bf16.msra.mxu0 %v1869_v7  ;;  %s2058_s21 = smov [#allocation8]  }
  0x40   :  { %1789 = vmatprep.subr.mxu0 %v2042_v12  ;;  %s1670_s29 = sshll.u32 %s2058_s21, 4  ;;  %s1671_s29 = int_to_ptr.vmem [resolvable:$true] %s1670_s29 }
  0x41   :  { %s2008_s7 = scalar_lea.vmem %s1671_s29, 256  ;;  %p2013_p11 = scmp.lt.s32.totalorder %s1671_s29, %s1671_s29 }
  0x42   :  { %1769 = vmatmul.mubr.msk.f32.vlgmr.msra.gmra.mrb[0].mxu0 %vm75_vm0, %v61_v9  ;;  %p2009_p10 = scmp.ne.s32.totalorder %s1671_s29, %s2008_s7  ;;  %p2014_p12 = scmp.lt.s32.totalorder %s2008_s7, %s2008_s7 }
  0x43   :  { %1771 = vmatprep.mubr.msk.f32.mxu0 %vm75_vm0, %v62_v10 }
  0x44   :  { %p2015_p13 = por %p2014_p12, %p2013_p11 }
  0x46   :  { %1772 = vmatmul.mubr.msk.f32.gmra.mrb[2].mxu0 %vm75_vm0, %v63_v11  ;;  %p2016_p0 = pnand %p2015_p13, %p2009_p10 }
  0x47   :  { %1791 = vmatprep.mubr.msk.f32.mxu0 %vm2043_vm1, %v2042_v12 }
  0xb9   :  { %v178_v21 = vpop.permute.xlu0 %177 }
 0x115   :  { %v1770_v14 = vpop.f32.mrb[0].mxu0 }
 0x116   :  { %v2151_v15 = vadd.f32 %v1770_v14, %v1683_v13  ;;  %v154_v16 = vpop.f32.mrb[1].mxu0 }
 0x117   :  { %v2153_v17 = vadd.f32 %v1683_v13, %v154_v16 }
 0x119   :  { %v1773_v18 = vpop.f32.mrb[2].mxu0 }
 0x11a   :  { %v2155_v19 = vadd.f32 %v1773_v18, %v1683_v13  ;;  %v164_v20 = vpop.f32.mrb[3].mxu0 }
 0x11b   :  { %v2157_v22 = vadd.f32 %v1683_v13, %v164_v20 }
 0x11d   :  { %v185_v23 = vmul.f32 %v178_v21, %v2157_v22 }
 0x11f   :  { %188 = vrot.lane.b32.xlu0 %v185_v23, %s2044_s2 }
 0x191   :  { %v189_v24 = vpop.permute.xlu0 %188 }
 0x192   :  { %1775 = vmatpush3.xpose.msk.msra.mxu1 %vm190_vm2, %v189_v24 }
 0x193   :  { %1779 = vmatprep.subr.mxu1 %v2042_v12 }
 0x195   :  { %1777 = vmatmul.mubr.msk.f32.vlgmr.msra.gmra.mrb[0].mxu1 %vm190_vm2, %v2153_v17 }
 0x196   :  { %1781 = vmatprep.mubr.msk.f32.mxu1 %vm2043_vm1, %v2042_v12 }
 0x268   :  { %v262_v25 = vpop.f32.mrb[0].mxu1 }
 0x269   :  { %v1778_v26 = vpop.f32.mrb[1].mxu1  ;;  %v266_v27 = vsel %vm190_vm2, %v262_v25, -inf }
 0x26a   :  { %267 = vmax.xlane.f32.xlu1 %v266_v27 }
 0x27b   :  { %182 = vperm.xlu1 %1905, %v174_v28  }
 0x27f   :  { %278 = vrot.lane.b32.xlu1 %v2157_v22, %s2045_s11 }
 0x283   :  { %356 = vrot.lane.b32.xlu1 %v185_v23, %s2046_s12 }
 0x287   :  { %354 = vrot.lane.b32.xlu1 %v2153_v17, %s2047_s13 }
 0x28b   :  { %521 = vrot.lane.b32.xlu1 %v185_v23, %s2048_s14 }
 0x28f   :  { %519 = vrot.lane.b32.xlu1 %v2153_v17, %s2049_s15 }
 0x293   :  { %684 = vrot.lane.b32.xlu1 %v2153_v17, %s2050_s16 }
 0x2f7   :  { %v268_v29 = vpop.xlane.xlu1 %267 }
 0x2f8   :  { %v269_v30 = vsub.f32 %v262_v25, %v268_v29 }
 0x2fa   :  { %v270_v31 = vmul.f32 1.442695, %v269_v30 }
 0x2fb   :  { %v183_v32 = vpop.permute.xlu1 %182 }
 0x2fc   :  { %1906 = vpow2.f32 %v270_v31  ;;  %v186_v33 = vmul.f32 %v183_v32, %v2155_v19 }
 0x2fe   :  { %867 = vrot.lane.b32.xlu1 %v186_v33, %s2044_s2 }
 0x2ff   :  { %v279_v34 = vpop.permute.xlu1 %278 }
 0x300   :  { %1780 = vmatpush3.msra.mxu1 %v279_v34 }
 0x301   :  { %1784 = vmatprep.subr.mxu1 %v2042_v12 }
 0x302   :  { %1034 = vrot.lane.b32.xlu1 %v186_v33, %s2046_s12 }
 0x303   :  { %v357_v37 = vpop.permute.xlu1 %356 }
 0x306   :  { %v1907_v35 = vpop.eup %1906  ;;  %1032 = vrot.lane.b32.xlu1 %v2151_v15, %s2047_s13 }
 0x307   :  { %v272_v36 = vsel %vm190_vm2, %v1907_v35, 0.0  ;;  %v355_v38 = vpop.permute.xlu1 %354 }
 0x308   :  { %273 = vadd.xlane.f32.xlu0 %v272_v36 }
 0x30a   :  { %1199 = vrot.lane.b32.xlu1 %v186_v33, %s2048_s14 }
 0x30b   :  { %v522_v39 = vpop.permute.xlu1 %521 }
 0x30e   :  { %1364 = vrot.lane.b32.xlu1 %v186_v33, %s2051_s3 }
 0x30f   :  { %v520_v41 = vpop.permute.xlu1 %519 }
 0x313   :  { %v685_v42 = vpop.permute.xlu1 %684 }
 0x31e   :  { %686 = vrot.lane.b32.xlu0 %v185_v23, %s2051_s3 }
 0x322   :  { %1197 = vrot.lane.b32.xlu0 %v2151_v15, %s2049_s15 }
 0x326   :  { %1362 = vrot.lane.b32.xlu0 %v2151_v15, %s2050_s16 }
 0x370   :  { %v868_v45 = vpop.permute.xlu1 %867 }
 0x374   :  { %v1035_v46 = vpop.permute.xlu1 %1034 }
 0x378   :  { %v1033_v48 = vpop.permute.xlu1 %1032 }
 0x37c   :  { %v1200_v49 = vpop.permute.xlu1 %1199 }
 0x380   :  { %v1365_v51 = vpop.permute.xlu1 %1364 }
 0x395   :  { %v274_v40 = vpop.xlane.xlu0 %273 }
 0x396   :  { %1908 = vrcp.f32 %v274_v40 }
 0x399   :  { %v687_v47 = vpop.permute.xlu0 %686 }
 0x39d   :  { %v1198_v50 = vpop.permute.xlu0 %1197 }
 0x3a0   :  { %v1909_v43 = vpop.eup %1908 }
 0x3a1   :  { %v276_v44 = vmul.f32 %v1909_v43, %v1907_v35  ;;  %v1363_v52 = vpop.permute.xlu0 %1362 }
 0x3a3   :  { %1782 = vmatmul.mubr.msk.f32.vlgmr.msra.gmra.mrb[2].mxu1 %vm190_vm2, %v276_v44 }
 0x3a4   :  { %1785 = vmatpush3.xpose.msk.msra.mxu1 %vm190_vm2, %v357_v37  ;;  %1786 = vmatprep.mubr.msk.f32.mxu1 %vm2043_vm1, %v2042_v12 }
 0x3a5   :  { %1794 = vmatprep.subr.mxu1 %v2042_v12 }
 0x3a7   :  { %1787 = vmatmul.mubr.msk.f32.vlgmr.msra.gmra.mrb[4].mxu1 %vm190_vm2, %v355_v38 }
 0x3a8   :  { %1795 = vmatpush3.xpose.msk.msra.mxu1 %vm190_vm2, %v522_v39  ;;  %1796 = vmatprep.mubr.msk.f32.mxu1 %vm2043_vm1, %v2042_v12 }
 0x3a9   :  { %1804 = vmatprep.subr.mxu1 %v2042_v12 }
 0x3ab   :  { %1797 = vmatmul.mubr.msk.f32.vlgmr.msra.gmra.mrb[6].mxu1 %vm190_vm2, %v520_v41 }
 0x3ac   :  { %1805 = vmatpush3.xpose.msk.msra.mxu1 %vm190_vm2, %v687_v47  ;;  %1806 = vmatprep.mubr.msk.f32.mxu1 %vm2043_vm1, %v2042_v12 }
 0x3ad   :  { %1814 = vmatprep.subr.mxu1 %v2042_v12 }
 0x3af   :  { %1807 = vmatmul.mubr.msk.f32.vlgmr.msra.gmra.mrb[8].mxu1 %vm190_vm2, %v685_v42 }
 0x3b0   :  { %1815 = vmatpush3.xpose.msk.msra.mxu1 %vm190_vm2, %v868_v45  ;;  %1816 = vmatprep.mubr.msk.f32.mxu1 %vm2043_vm1, %v2042_v12 }
 0x3b1   :  { %1824 = vmatprep.subr.mxu1 %v2042_v12 }
 0x3b3   :  { %1817 = vmatmul.mubr.msk.f32.vlgmr.msra.gmra.mrb[10].mxu1 %vm190_vm2, %v2151_v15 }
 0x3b4   :  { %1825 = vmatpush3.xpose.msk.msra.mxu1 %vm190_vm2, %v1035_v46  ;;  %1826 = vmatprep.mubr.msk.f32.mxu1 %vm2043_vm1, %v2042_v12 }
 0x3b5   :  { %1834 = vmatprep.subr.mxu1 %v2042_v12 }
 0x3b7   :  { %1827 = vmatmul.mubr.msk.f32.vlgmr.msra.gmra.mrb[12].mxu1 %vm190_vm2, %v1033_v48 }
 0x3b8   :  { %1835 = vmatpush3.xpose.msk.msra.mxu1 %vm190_vm2, %v1200_v49  ;;  %1836 = vmatprep.mubr.msk.f32.mxu1 %vm2043_vm1, %v2042_v12 }
 0x3b9   :  { %1844 = vmatprep.subr.mxu1 %v2042_v12 }
 0x3bb   :  { %1837 = vmatmul.mubr.msk.f32.vlgmr.msra.gmra.mrb[14].mxu1 %vm190_vm2, %v1198_v50 }
 0x3bc   :  { %1845 = vmatpush3.xpose.msk.msra.mxu1 %vm190_vm2, %v1365_v51  ;;  %1846 = vmatprep.mubr.msk.f32.mxu1 %vm2043_vm1, %v2042_v12 }
 0x3bf   :  { %1847 = vmatmul.mubr.msk.f32.vlgmr.msra.gmra.mrb[16].mxu1 %vm190_vm2, %v1363_v52 }
 0x476   :  { %v2219_v53 = vpop.f32.mrb[2].mxu1 }
 0x477   :  { %v1783_v54 = vpop.f32.mrb[3].mxu1 }
 0x47a   :  { %v428_v55 = vpop.f32.mrb[4].mxu1 }
 0x47b   :  { %v1788_v56 = vpop.f32.mrb[5].mxu1  ;;  %v432_v57 = vsel %vm190_vm2, %v428_v55, -inf }
 0x47c   :  { %433 = vmax.xlane.f32.xlu1 %v432_v57 }
 0x47e   :  { %v593_v58 = vpop.f32.mrb[6].mxu1 }
 0x47f   :  { %v1798_v59 = vpop.f32.mrb[7].mxu1  ;;  %v597_v60 = vsel %vm190_vm2, %v593_v58, -inf }
 0x480   :  { %598 = vmax.xlane.f32.xlu0 %v597_v60 }
 0x482   :  { %v758_v61 = vpop.f32.mrb[8].mxu1 }
 0x483   :  { %v1808_v62 = vpop.f32.mrb[9].mxu1  ;;  %v762_v63 = vsel %vm190_vm2, %v758_v61, -inf }
 0x484   :  { %763 = vmax.xlane.f32.xlu0 %v762_v63 }
 0x486   :  { %v940_v0 = vpop.f32.mrb[10].mxu1 }
 0x487   :  { %v1818_v1 = vpop.f32.mrb[11].mxu1  ;;  %v944_v2 = vsel %vm190_vm2, %v940_v0, -inf }
 0x488   :  { %945 = vmax.xlane.f32.xlu1 %v944_v2 }
 0x48a   :  { %v1106_v3 = vpop.f32.mrb[12].mxu1 }
 0x48b   :  { %v1828_v4 = vpop.f32.mrb[13].mxu1  ;;  %v1110_v5 = vsel %vm190_vm2, %v1106_v3, -inf }
 0x48c   :  { %1111 = vmax.xlane.f32.xlu0 %v1110_v5 }
 0x48e   :  { %v1271_v6 = vpop.f32.mrb[14].mxu1 }
 0x48f   :  { %v1838_v7 = vpop.f32.mrb[15].mxu1  ;;  %v1275_v8 = vsel %vm190_vm2, %v1271_v6, -inf }
 0x490   :  { %1276 = vmax.xlane.f32.xlu1 %v1275_v8 }
 0x492   :  { %v1436_v9 = vpop.f32.mrb[16].mxu1 }
 0x493   :  { %v1848_v10 = vpop.f32.mrb[17].mxu1  ;;  %v1440_v11 = vsel %vm190_vm2, %v1436_v9, -inf }
 0x494   :  { %1441 = vmax.xlane.f32.xlu0 %v1440_v11 }
 0x4a1   :  { %608 = vrot.lane.b32.xlu1 %v2157_v22, %s2052_s1 }
 0x4a5   :  { %773 = vrot.lane.b32.xlu1 %v2157_v22, %s2053_s17 }
 0x4aa   :  { %443 = vrot.lane.b32.xlu0 %v2157_v22, %s2054_s18 }
 0x509   :  { %v434_v13 = vpop.xlane.xlu1 %433 }
 0x50a   :  { %v435_v14 = vsub.f32 %v428_v55, %v434_v13 }
 0x50c   :  { %v436_v16 = vmul.f32 1.442695, %v435_v14 }
 0x50d   :  { %v599_v18 = vpop.xlane.xlu0 %598 }
 0x50e   :  { %1910 = vpow2.f32 %v436_v16  ;;  %v600_v20 = vsub.f32 %v593_v58, %v599_v18 }
 0x510   :  { %v601_v21 = vmul.f32 1.442695, %v600_v20 }
 0x511   :  { %v764_v24 = vpop.xlane.xlu0 %763 }
 0x512   :  { %1912 = vpow2.f32 %v601_v21  ;;  %v765_v30 = vsub.f32 %v758_v61, %v764_v24  ;;  %v1542_v24 = vld [vmem:[%s2320_s4] sm:$0xff] }
 0x514   :  { %v766_v33 = vmul.f32 1.442695, %v765_v30 }
 0x515   :  { %v946_v31 = vpop.xlane.xlu1 %945 }
 0x516   :  { %v947_v32 = vsub.f32 %v940_v0, %v946_v31  ;;  %1914 = vpow2.f32 %v766_v33 }
 0x518   :  { %v1911_v23 = vpop.eup %1910  ;;  %v948_v36 = vmul.f32 1.442695, %v947_v32 }
 0x519   :  { %v438_v25 = vsel %vm190_vm2, %v1911_v23, 0.0  ;;  %v1112_v27 = vpop.xlane.xlu0 %1111 }
 0x51a   :  { %439 = vadd.xlane.f32.xlu1 %v438_v25  ;;  %v1113_v34 = vsub.f32 %v1106_v3, %v1112_v27  ;;  %1916 = vpow2.f32 %v948_v36  ;;  %v1544_v27 = vld [vmem:[%s2320_s4 + $0x10] sm:$0xff] }
 0x51c   :  { %v1913_v26 = vpop.eup %1912  ;;  %v1114_v38 = vmul.f32 1.442695, %v1113_v34 }
 0x51d   :  { %v603_v28 = vsel %vm190_vm2, %v1913_v26, 0.0  ;;  %v1277_v35 = vpop.xlane.xlu1 %1276 }
 0x51e   :  { %604 = vadd.xlane.f32.xlu0 %v603_v28  ;;  %v1278_v37 = vsub.f32 %v1271_v6, %v1277_v35  ;;  %1918 = vpow2.f32 %v1114_v38  ;;  %v1545_v28 = vld [vmem:[%s2320_s4 + $0x18] sm:$0xff] }
 0x520   :  { %v1279_v40 = vmul.f32 1.442695, %v1278_v37  ;;  %v1915_v42 = vpop.eup %1914 }
 0x521   :  { %v1442_v29 = vpop.xlane.xlu0 %1441  ;;  %v768_v44 = vsel %vm190_vm2, %v1915_v42, 0.0  ;;  %v609_v52 = vpop.permute.xlu1 %608 }
 0x522   :  { %v1443_v39 = vsub.f32 %v1436_v9, %v1442_v29  ;;  %1920 = vpow2.f32 %v1279_v40 }
 0x524   :  { %v1444_v41 = vmul.f32 1.442695, %v1443_v39  ;;  %v1917_v43 = vpop.eup %1916 }
 0x525   :  { %v444_v22 = vpop.permute.xlu0 %443  ;;  %v950_v48 = vsel %vm190_vm2, %v1917_v43, 0.0  ;;  %v774_v54 = vpop.permute.xlu1 %773 }
 0x526   :  { %1790 = vmatpush3.msra.mxu0 %v444_v22  ;;  %1922 = vpow2.f32 %v1444_v41  ;;  %v1877_v22 = vpack.c.bf16 %v1545_v28, %v1544_v27 }
 0x527   :  { %1799 = vmatprep.subr.mxu0 %v2042_v12 }
 0x528   :  { %v1919_v45 = vpop.eup %1918 }
 0x529   :  { %v1116_v47 = vsel %vm190_vm2, %v1919_v45, 0.0 }
 0x52b   :  { %1121 = vrot.lane.b32.xlu1 %v2155_v19, %s2054_s18 }
 0x52c   :  { %v1921_v46 = vpop.eup %1920 }
 0x52d   :  { %v1281_v50 = vsel %vm190_vm2, %v1921_v46, 0.0 }
 0x530   :  { %v2242_v49 = vpop.eup %1922 }
 0x531   :  { %v1446_v51 = vsel %vm190_vm2, %v2242_v49, 0.0 }
 0x534   :  { %956 = vrot.lane.b32.xlu0 %v2155_v19, %s2045_s11 }
 0x54f   :  { %769 = vadd.xlane.f32.xlu1 %v768_v44 }
 0x553   :  { %1117 = vadd.xlane.f32.xlu1 %v1116_v47  ;;  %951 = vadd.xlane.f32.xlu0 %v950_v48 }
 0x557   :  { %1282 = vadd.xlane.f32.xlu0 %v1281_v50  ;;  %1447 = vadd.xlane.f32.xlu1 %v1446_v51 }
 0x568   :  { %1451 = vrot.lane.b32.xlu1 %v2155_v19, %s2053_s17 }
 0x56d   :  { %1286 = vrot.lane.b32.xlu0 %v2155_v19, %s2052_s1 }
 0x5a7   :  { %v440_v55 = vpop.xlane.xlu1 %439 }
 0x5a8   :  { %1924 = vrcp.f32 %v440_v55 }
 0x5ab   :  { %v605_v56 = vpop.xlane.xlu0 %604  ;;  %v1122_v19 = vpop.permute.xlu1 %1121 }
 0x5ac   :  { %1926 = vrcp.f32 %v605_v56 }
 0x5af   :  { %v957_v61 = vpop.permute.xlu0 %956 }
 0x5b2   :  { %v1925_v57 = vpop.eup %1924 }
 0x5b3   :  { %v442_v58 = vmul.f32 %v1925_v57, %v1911_v23 }
 0x5b5   :  { %1792 = vmatmul.mubr.msk.f32.vlgmr.msra.gmra.mrb[4].mxu0 %vm190_vm2, %v442_v58 }
 0x5b6   :  { %v1927_v59 = vpop.eup %1926  ;;  %1800 = vmatpush3.msra.mxu0 %v609_v52  ;;  %1801 = vmatprep.mubr.msk.f32.mxu0 %vm2043_vm1, %v2042_v12 }
 0x5b7   :  { %v607_v60 = vmul.f32 %v1927_v59, %v1913_v26  ;;  %1809 = vmatprep.subr.mxu0 %v2042_v12 }
 0x5b9   :  { %1802 = vmatmul.mubr.msk.f32.vlgmr.msra.gmra.mrb[6].mxu0 %vm190_vm2, %v607_v60 }
 0x5ba   :  { %1810 = vmatpush3.msra.mxu0 %v774_v54  ;;  %1811 = vmatprep.mubr.msk.f32.mxu0 %vm2043_vm1, %v2042_v12 }
 0x5bb   :  { %1819 = vmatprep.subr.mxu0 %v2042_v12 }
 0x5dc   :  { %v770_v62 = vpop.xlane.xlu1 %769 }
 0x5dd   :  { %1928 = vrcp.f32 %v770_v62 }
 0x5e0   :  { %v952_v63 = vpop.xlane.xlu0 %951  ;;  %v1118_v0 = vpop.xlane.xlu1 %1117 }
 0x5e1   :  { %1930 = vrcp.f32 %v952_v63 }
 0x5e2   :  { %1932 = vrcp.f32 %v1118_v0 }
 0x5e4   :  { %v1283_v1 = vpop.xlane.xlu0 %1282  ;;  %v1448_v4 = vpop.xlane.xlu1 %1447 }
 0x5e5   :  { %1934 = vrcp.f32 %v1283_v1 }
 0x5e6   :  { %1936 = vrcp.f32 %v1448_v4 }
 0x5e7   :  { %v1929_v2 = vpop.eup %1928 }
 0x5e8   :  { %v772_v3 = vmul.f32 %v1929_v2, %v1915_v42  ;;  %v1287_v10 = vpop.permute.xlu0 %1286  ;;  %v1452_v14 = vpop.permute.xlu1 %1451 }
 0x5ea   :  { %1812 = vmatmul.mubr.msk.f32.vlgmr.msra.gmra.mrb[8].mxu0 %vm190_vm2, %v772_v3 }
 0x5eb   :  { %1820 = vmatpush3.msra.mxu0 %v957_v61  ;;  %1821 = vmatprep.mubr.msk.f32.mxu0 %vm2043_vm1, %v2042_v12  ;;  %v1931_v5 = vpop.eup %1930 }
 0x5ec   :  { %1829 = vmatprep.subr.mxu0 %v2042_v12  ;;  %v954_v6 = vmul.f32 %v1931_v5, %v1917_v43  ;;  %v1933_v7 = vpop.eup %1932 }
 0x5ed   :  { %v1120_v8 = vmul.f32 %v1933_v7, %v1919_v45 }
 0x5ee   :  { %1822 = vmatmul.mubr.msk.f32.vlgmr.msra.gmra.mrb[10].mxu0 %vm190_vm2, %v954_v6 }
 0x5ef   :  { %1830 = vmatpush3.msra.mxu0 %v1122_v19  ;;  %1831 = vmatprep.mubr.msk.f32.mxu0 %vm2043_vm1, %v2042_v12  ;;  %v1935_v9 = vpop.eup %1934 }
 0x5f0   :  { %1839 = vmatprep.subr.mxu0 %v2042_v12  ;;  %v1285_v11 = vmul.f32 %v1935_v9, %v1921_v46  ;;  %v1937_v13 = vpop.eup %1936 }
 0x5f1   :  { %v1450_v16 = vmul.f32 %v1937_v13, %v2242_v49 }
 0x5f2   :  { %1832 = vmatmul.mubr.msk.f32.vlgmr.msra.gmra.mrb[12].mxu0 %vm190_vm2, %v1120_v8 }
 0x5f3   :  { %1840 = vmatpush3.msra.mxu0 %v1287_v10  ;;  %1841 = vmatprep.mubr.msk.f32.mxu0 %vm2043_vm1, %v2042_v12 }
 0x5f4   :  { %1849 = vmatprep.subr.mxu0 %v2042_v12 }
 0x5f6   :  { %1842 = vmatmul.mubr.msk.f32.vlgmr.msra.gmra.mrb[14].mxu0 %vm190_vm2, %v1285_v11 }
 0x5f7   :  { %1850 = vmatpush3.msra.mxu0 %v1452_v14  ;;  %1851 = vmatprep.mubr.msk.f32.mxu0 %vm2043_vm1, %v2042_v12  ;;  %v1543_v12 = vld [vmem:[%s2320_s4 + $0x8] sm:$0xff]  ;;  %s2057_s4 = smov 32  }
 0x5f8   :  { %v1873_v25 = vpack.c.bf16 %v1543_v12, %v1542_v24 }
 0x5fa   :  { %1852 = vmatmul.mubr.msk.f32.vlgmr.msra.gmra.mrb[16].mxu0 %vm190_vm2, %v1450_v16  ;;  %1874 = vmatprep.subr.bf16.mxu1 %v1873_v25 }
 0x5fb   :  { %1876 = vmatpush3.bf16.msra.mxu1 %v1873_v25 }
 0x5fc   :  { %1878 = vmatprep.subr.bf16.mxu1 %v1877_v22 }
 0x5ff   :  { %1880 = vmatpush3.bf16.msra.mxu1 %v1877_v22 }
 0x688   :  { %v515_v18 = vpop.f32.mrb[4].mxu0 }
 0x689   :  { %850 = vrot.lane.b32.xlu0 %v515_v18, %s2039_s6  ;;  %v1793_v20 = vpop.f32.mrb[5].mxu0 }
 0x68c   :  { %v680_v21 = vpop.f32.mrb[6].mxu0 }
 0x68d   :  { %854 = vrot.lane.b32.xlu1 %v680_v21, %s2055_s19  ;;  %v1803_v23 = vpop.f32.mrb[7].mxu0 }
 0x6bd   :  { %v845_v26 = vpop.f32.mrb[8].mxu0 }
 0x6be   :  { %858 = vrot.lane.b32.xlu1 %v845_v26, %s2056_s0  ;;  %v1813_v29 = vpop.f32.mrb[9].mxu0 }
 0x6c1   :  { %v1028_v30 = vpop.f32.mrb[10].mxu0 }
 0x6c2   :  { %v1823_v31 = vpop.f32.mrb[11].mxu0 }
 0x6c5   :  { %v1193_v32 = vpop.f32.mrb[12].mxu0 }
 0x6c6   :  { %1528 = vrot.lane.b32.xlu0 %v1193_v32, %s2039_s6  ;;  %v1833_v33 = vpop.f32.mrb[13].mxu0 }
 0x6c9   :  { %v1358_v34 = vpop.f32.mrb[14].mxu0 }
 0x6ca   :  { %1532 = vrot.lane.b32.xlu0 %v1358_v34, %s2055_s19  ;;  %v1843_v35 = vpop.f32.mrb[15].mxu0 }
 0x6cd   :  { %v1523_v36 = vpop.f32.mrb[16].mxu0 }
 0x6ce   :  { %1536 = vrot.lane.b32.xlu1 %v1523_v36, %s2056_s0  ;;  %v1853_v37 = vpop.f32.mrb[17].mxu0 }
 0x6fb   :  { %v851_v38 = vpop.permute.xlu0 %850 }
 0x6fc   :  { %v861_v40 = vsel %vm190_vm2, %v2219_v53, %v851_v38 }
 0x6ff   :  { %v855_v39 = vpop.permute.xlu1 %854 }
 0x700   :  { %v863_v41 = vsel %vm862_vm3, %v861_v40, %v855_v39 }
 0x730   :  { %v859_v42 = vpop.permute.xlu1 %858 }
 0x731   :  { %v865_v43 = vsel %vm864_vm4, %v863_v41, %v859_v42 }
 0x732   :  { %1862 = vmatprep.mubr.msk.f32.mxu1 %vm75_vm0, %v865_v43 }
 0x738   :  { %v1529_v44 = vpop.permute.xlu0 %1528 }
 0x739   :  { %v1539_v46 = vsel %vm190_vm2, %v1028_v30, %v1529_v44 }
 0x73c   :  { %v1533_v45 = vpop.permute.xlu0 %1532 }
 0x73d   :  { %v1540_v47 = vsel %vm862_vm3, %v1539_v46, %v1533_v45 }
 0x740   :  { %v1537_v48 = vpop.permute.xlu1 %1536 }
 0x741   :  { %v1541_v49 = vsel %vm864_vm4, %v1540_v47, %v1537_v48 }
 0x742   :  { %1863 = vmatmul.mubr.msk.f32.vlgmr.msra.gmra.mrb[18].mxu1 %vm75_vm0, %v1541_v49 }
 0x815   :  { %v1864_v50 = vpop.f32.mrb[18].mxu1 }
 0x816   :  { %1631 = vrot.lane.b32.xlu1 %v1864_v50, %s2044_s2  ;;  %v1618_v51 = vpop.f32.mrb[19].mxu1 }
 0x817   :  { %1629 = vrot.lane.b32.xlu0 %v1618_v51, %s2044_s2 }
 0x888   :  { %v1632_v53 = vpop.permute.xlu1 %1631 }
 0x889   :  { %v1636_v52 = vadd.f32 %v1632_v53, %v2151_v15  ;;  %v1630_v54 = vpop.permute.xlu0 %1629 }
 0x88a   :  { %v1635_v55 = vadd.f32 %v1630_v54, %v2153_v17 }
 0x88b   :  { %v1640_v56 = vmul.f32 0.044715, %v1636_v52  ;;  %v1638_v3 = vmul.f32 0.5, %v1636_v52 }
 0x88c   :  { %v1639_v57 = vmul.f32 0.044715, %v1635_v55  ;;  %v1637_v15 = vmul.f32 0.5, %v1635_v55 }
 0x88d   :  { %v1642_v58 = vmul.f32 %v1640_v56, %v1636_v52 }
 0x88e   :  { %v1641_v59 = vmul.f32 %v1639_v57, %v1635_v55 }
 0x88f   :  { %v1644_v60 = vmul.f32 %v1642_v58, %v1636_v52 }
 0x890   :  { %v1643_v19 = vmul.f32 %v1641_v59, %v1635_v55 }
 0x891   :  { %v1646_v61 = vadd.f32 %v1644_v60, %v1636_v52 }
 0x892   :  { %v1645_v62 = vadd.f32 %v1643_v19, %v1635_v55 }
 0x893   :  { %v1648_v63 = vmul.f32 0.7978846, %v1646_v61 }
 0x894   :  { %v1647_v0 = vmul.f32 0.7978846, %v1645_v62 }
 0x895   :  { %1938 = vtanh.f32 %v1648_v63 }
 0x896   :  { %1940 = vtanh.f32 %v1647_v0 }
 0x89f   :  { %v1939_v1 = vpop.eup %1938 }
 0x8a0   :  { %v1941_v2 = vpop.eup %1940  ;;  %v1652_v4 = vadd.f32 1.0, %v1939_v1 }
 0x8a1   :  { %v1651_v5 = vadd.f32 1.0, %v1941_v2 }
 0x8a2   :  { %v1654_v6 = vmul.f32 %v1652_v4, %v1638_v3 }
 0x8a3   :  { %v1653_v17 = vmul.f32 %v1651_v5, %v1637_v15 }
 0x8a4   :  { %1659 = vrot.lane.b32.xlu1 %v1654_v6, %s2057_s4 }
 0x8a5   :  { %1657 = vrot.lane.b32.xlu0 %v1653_v17, %s2057_s4 }
 0x916   :  { %v1660_v7 = vpop.permute.xlu1 %1659 }
 0x917   :  { %1664 = vst.msk [vmem:[#allocation8 + $0x8] sm:$0xff] %vm75_vm0, %v1660_v7  ;;  %v1658_v8 = vpop.permute.xlu0 %1657 }
 0x918   :  { %1663 = vst.msk [vmem:[#allocation8] sm:$0xff] %vm75_vm0, %v1658_v8 }
 0x919   :  { %2019 = shalt.err (!%p2016_p0)
}
 0x91a   :  { %s2020_s9 = scalar_lea.hbm %s2321_s5, 256 }
 0x91b   :  { %p2021_p1 = scmp.ne.s32.totalorder %s2321_s5, %s2020_s9  ;;  %p2024_p2 = scmp.lt.u32.totalorder %s2020_s9, %s2321_s5 }
 0x91d   :  { %p2026_p3 = pnand %p2024_p2, %p2021_p1 }
 0x91f   :  { %2029 = shalt.err (!%p2026_p3)
}
 0x920   :  { %1676 = dma.vmem_to_hbm [thread:$0]  %s1671_s29, 256, %s2321_s5, [#allocation4], %s2038_s30, %s2038_s30, %s2039_s6  }
 0x921   :  { %2034 = dma.done.wait [#allocation4], 256  }
 0x922   :  { %2035 = vsyncadd [#allocation4], 4294967040 }
 0x923   :  { %1680 = vsyncpa [#allocation3], 1 }
 0x924   :  { %1681 = vsyncpa [#allocation6], 1 }
 0x925   :  { %1682 = vsyncpa [#allocation4], 1 }

</bundles_post_ra>
